<compile_context>
chip_gen: v7x
topology: tpu7x:2x2x1
jax: 0.10.0
libtpu: 0.0.40
codegen_flags: <defaults>
</compile_context>

<pallas_src>
import functools

import numpy as np
import jax
import jax.numpy as jnp
from jax import lax
from jax.experimental import pallas as pl
from jax.experimental.pallas import tpu as pltpu


def gen_gaussian_kernel(k_size=5, sigma=1.0, dtype=np.float32):
    """Matches Communication.init_gaussian_filter._gen_gaussian_kernel."""
    center = k_size // 2
    x, y = np.mgrid[0 - center:k_size - center, 0 - center:k_size - center]
    g = 1.0 / (2.0 * np.pi * sigma) * np.exp(
        -(np.square(x) + np.square(y)) / (2.0 * np.square(sigma)))
    return g.astype(dtype)


def _make_comm_kernel(gy, gx, thre, N, H, W, k):
    """Per-agent kernel: separable gaussian conv + threshold + N-way
    replication with diagonal override.  Grid axis = agent index j (the
    'sender' / inner index of the flat N*N layout)."""
    gy = [float(v) for v in gy]
    gx = [float(v) for v in gx]
    thre = float(thre)
    c = k // 2

    def kernel(conf_ref, maps_ref, mask_ref, sum_ref):
        j = pl.program_id(0)                 # agent index
        x = conf_ref[0, 0]                   # (H, W) f32, W on the 128-lane axis

        # ---- separable "same"-zero-padded gaussian, pass 1: along H -------
        # Zero-filled shifts via static slice + concat: no wrap-around, so no
        # validity select is needed at all for this pass.
        tmp = x * gy[c]
        for dy in range(k):
            oy = dy - c
            if oy == 0:
                continue
            if oy > 0:
                s = jnp.concatenate(
                    [x[oy:, :], jnp.zeros((oy, W), jnp.float32)], axis=0)
            else:
                s = jnp.concatenate(
                    [jnp.zeros((-oy, W), jnp.float32), x[:H + oy, :]], axis=0)
            tmp = tmp + s * gy[dy]

        # ---- pass 2: along W (lanes) -- XLU rotate + 1-D edge mask --------
        acc = tmp * gx[c]
        if k > 1:
            iw = lax.broadcasted_iota(jnp.int32, (H, W), 1)
            for dx in range(k):
                ox = dx - c
                if ox == 0:
                    continue
                s = pltpu.roll(tmp, (-ox) % W, axis=1)   # out[w] = tmp[w+ox]
                valid = (iw < (W - ox)) if ox > 0 else (iw >= -ox)
                acc = acc + jnp.where(valid, s, 0.0) * gx[dx]

        keep = acc > thre                       # comm_mask (pre diag-override)
        m = keep.astype(jnp.float32)
        # per-agent mask sum, written as a lane-dense (8,128) slab (unmasked vst)
        sum_ref[...] = jnp.broadcast_to(jnp.sum(m), (1, 8, 128))

        # Replicate over the N receiver rows with one contiguous block store,
        # then overwrite the diagonal row (receiver i == sender j) with the
        # all-ones mask / un-gated smoothed map.
        gated = jnp.where(keep, acc, 0.0)
        maps_ref[...] = jnp.broadcast_to(gated[None, None], (N, 1, H, W))
        mask_ref[...] = jnp.broadcast_to(
            keep.astype(mask_ref.dtype)[None, None], (N, 1, H, W))
        maps_ref[j, 0] = acc
        mask_ref[j, 0] = jnp.ones((H, W), mask_ref.dtype)

    return kernel


@functools.lru_cache(maxsize=None)
def _build_comm_call(N, H, W, thre, k_size, c_sigma, smooth):
    """Builds (and caches) the jitted pallas_call wrapper for one (N, H, W)."""
    if smooth:
        k = int(k_size)
        c = k // 2
        g64 = gen_gaussian_kernel(k, c_sigma, dtype=np.float64)
        # Exact rank-1 factorization: g[i,j] = g[i,c] * (g[c,j] / g[c,c]).
        gy = list(g64[:, c])
        gx = list(g64[c, :] / g64[c, c])
    else:
        k = 1
        gy, gx = [1.0], [1.0]

    kern = _make_comm_kernel(gy, gx, thre, N, H, W, k)

    mask_dtype = jnp.bfloat16   # 0/1 exact in bf16; halves mask writeback bytes

    # VMEM budget (double-buffered blocks), with headroom; capped well under
    # v7x's 64 MiB physical limit.
    blk_bytes = (H * W * 4              # input block (f32)
                 + N * H * W * 4        # maps block (f32)
                 + N * H * W * 2        # mask block (bf16)
                 + 8 * 128 * 4)         # sums block
    vmem_limit = int(min(max(4 * blk_bytes, 32 * 1024 * 1024),
                         60 * 1024 * 1024))

    call = pl.pallas_call(
        kern,
        out_shape=(
            jax.ShapeDtypeStruct((N, N, H, W), jnp.float32),   # smoothed * nodiag
            jax.ShapeDtypeStruct((N, N, H, W), mask_dtype),    # comm_mask_nodiag
            jax.ShapeDtypeStruct((N, 8, 128), jnp.float32),    # per-agent sums
        ),
        grid_spec=pltpu.PrefetchScalarGridSpec(
            num_scalar_prefetch=0,
            grid=(N,),
            in_specs=[pl.BlockSpec((1, 1, H, W), lambda j: (j, 0, 0, 0))],
            out_specs=(
                pl.BlockSpec((N, 1, H, W), lambda j: (0, j, 0, 0)),
                pl.BlockSpec((N, 1, H, W), lambda j: (0, j, 0, 0)),
                pl.BlockSpec((1, 8, 128), lambda j: (j, 0, 0)),
            ),
        ),
        compiler_params=pltpu.CompilerParams(
            dimension_semantics=("parallel",),
            vmem_limit_bytes=vmem_limit),
    )

    def run(conf):
        maps4, masks4, sums = call(conf)
        comm_maps = maps4.reshape(N * N, 1, H, W)    # row order i*N + j
        comm_masks = masks4.reshape(N * N, 1, H, W)
        # pre-override mask sum over all N*N rows = N * sum_j sum(mask_j);
        # rate = N * sum(sums) / (H*W*N*N) = sum(sums) / (H*W*N).
        rate = jnp.sum(sums[:, 0, 0]) / float(H * W * N)
        return comm_maps, comm_masks, rate

    return jax.jit(run)


def communication_forward(batch_confidence_maps, record_len, pairwise_t_matrix,
                          *, thre, k_size=3, c_sigma=1.0, smooth=True):
    """Pallas version of Communication.forward (batch_request_maps=None).

    Note: communication_masks are returned in bfloat16 (values are exactly
    0.0 / 1.0) to halve HBM writeback of the largest output."""
    # TODO(synk): record_len is converted to static Python ints (one compile
    # per distinct N), matching the dynamic-N behavior of the PyTorch loop.
    B = pairwise_t_matrix.shape[0]
    record_len = [int(n) for n in record_len]

    communication_masks = []
    communication_rates = []
    batch_communication_maps = []

    for b in range(B):
        N = record_len[b]
        conf = jnp.asarray(batch_confidence_maps[b], jnp.float32)   # (N, 1, H, W)
        H, W = conf.shape[-2], conf.shape[-1]
        run = _build_comm_call(N, H, W, float(thre), int(k_size),
                               float(c_sigma), bool(smooth))
        comm_maps, comm_masks, rate = run(conf)
        batch_communication_maps.append(comm_maps)
        communication_masks.append(comm_masks)
        communication_rates.append(rate)

    communication_rates = sum(communication_rates) / B
    communication_masks = jnp.concatenate(communication_masks, axis=0)
    return batch_communication_maps, communication_masks, communication_rates


def reference_forward(batch_confidence_maps, record_len, thre, k_size, c_sigma):
    """Pure numpy reference mirroring the PyTorch forward (request_maps=None).

    Also returns the raw smoothed maps per batch (for threshold-borderline
    aware comparison)."""
    weights = gen_gaussian_kernel(k_size, c_sigma, dtype=np.float32)
    p = (k_size - 1) // 2
    masks_all, rates, maps_all, sm_all = [], [], [], []
    for b in range(len(batch_confidence_maps)):
        N = int(record_len[b])
        conf = np.asarray(batch_confidence_maps[b], dtype=np.float32)   # (N,1,H,W)
        H, W = conf.shape[-2:]
        curr = np.concatenate([conf[None]] * N, axis=0).reshape(N * N, 1, H, W)
        pad = np.pad(curr, ((0, 0), (0, 0), (p, p), (p, p)))
        sm = np.zeros_like(curr)
        for dy in range(k_size):
            for dx in range(k_size):
                sm += weights[dy, dx] * pad[:, :, dy:dy + H, dx:dx + W]
        mask = (sm > thre).astype(np.float32)
        rate = mask.sum() / (H * W * N * N)
        nodiag = mask.copy()
        nodiag[::N + 1] = 1.0
        masks_all.append(nodiag)
        rates.append(rate)
        maps_all.append(sm * nodiag)
        sm_all.append(sm)
    return maps_all, np.concatenate(masks_all, 0), sum(rates) / len(rates), sm_all


if __name__ == "__main__":
    key = jax.random.PRNGKey(0)
    B, N, H, W = 2, 2, 16, 128
    thre, k_size, c_sigma = 0.4, 3, 1.0

    keys = jax.random.split(key, B)
    # confidence maps in [0, 1] (already post-sigmoid, single channel), NCHW
    batch_confidence_maps = [
        jax.random.uniform(keys[b], (N, 1, H, W), dtype=jnp.float32)
        for b in range(B)
    ]
    record_len = jnp.array([N] * B, dtype=jnp.int32)
    pairwise_t_matrix = jnp.tile(
        jnp.eye(2, 3, dtype=jnp.float32)[None, None, None], (B, N, N, 1, 1))

    batch_comm_maps, comm_masks, comm_rate = communication_forward(
        batch_confidence_maps, record_len, pairwise_t_matrix,
        thre=thre, k_size=k_size, c_sigma=c_sigma, smooth=True)
    jax.block_until_ready(comm_masks)
    jax.block_until_ready(comm_rate)
    for arr in batch_comm_maps:
        jax.block_until_ready(arr)

    # correctness check against a pure-numpy reference; elements whose smoothed
    # value lies within 1e-5 of the threshold are excluded (FP reassociation in
    # the separable conv could flip the comparison exactly at the threshold).
    ref_maps, ref_masks, ref_rate, ref_sm = reference_forward(
        batch_confidence_maps, record_len, thre, k_size, c_sigma)

    masks_np = np.asarray(comm_masks.astype(jnp.float32))
    off = 0
    rate_slack = 0.0
    for b in range(B):
        Nb = int(record_len[b])
        rows = Nb * Nb
        care = np.abs(ref_sm[b] - thre) > 1e-5
        rate_slack += float((~care).sum()) / (H * W * Nb * Nb)
        np.testing.assert_allclose(np.asarray(batch_comm_maps[b])[care],
                                   ref_maps[b][care], rtol=1e-5, atol=1e-5)
        np.testing.assert_allclose(masks_np[off:off + rows][care],
                                   ref_masks[off:off + rows][care], atol=1e-5)
        off += rows
    rate_slack /= B
    np.testing.assert_allclose(float(comm_rate), float(ref_rate),
                               rtol=1e-5, atol=rate_slack + 1e-6)

    print("KERNEL_OK")
</pallas_src>

<mosaic_0001>
module attributes {stable_mosaic.version = 11 : i64} {
  func.func @kernel(%arg0: i32, %arg1: memref<1x1x16x128xf32, #tpu.memory_space<vmem>>, %arg2: memref<2x1x16x128xf32, #tpu.memory_space<vmem>>, %arg3: memref<2x1x16x128xbf16, #tpu.memory_space<vmem>>, %arg4: memref<1x8x128xf32, #tpu.memory_space<vmem>>) attributes {dimension_semantics = [#tpu.dimension_semantics<parallel>], iteration_bounds = array<i64: 2>, scalar_prefetch = 0 : i64, scratch_operands = 0 : i64, tpu.core_type = #tpu.core_type<tc>, window_params = [{transform_indices = @transform_0, window_bounds = array<i64: 1, 1, 16, 128>}, {transform_indices = @transform_1, window_bounds = array<i64: 2, 1, 16, 128>}, {transform_indices = @transform_2, window_bounds = array<i64: 2, 1, 16, 128>}, {transform_indices = @transform_3, window_bounds = array<i64: 1, 8, 128>}]} {
    %c0 = arith.constant 0 : index
    %c0_0 = arith.constant 0 : index
    %c0_1 = arith.constant 0 : index
    %c0_2 = arith.constant 0 : index
    %0 = vector.load %arg1[%c0, %c0_0, %c0_1, %c0_2] : memref<1x1x16x128xf32, #tpu.memory_space<vmem>>, vector<1x1x16x128xf32>
    %1 = vector.shape_cast %0 : vector<1x1x16x128xf32> to vector<16x128xf32>
    %cst = arith.constant 0.159154937 : f32
    %2 = vector.broadcast %cst : f32 to vector<16x128xf32>
    %3 = arith.mulf %1, %2 : vector<16x128xf32>
    %cst_3 = arith.constant 0.000000e+00 : f32
    %4 = vector.broadcast %cst_3 : f32 to vector<1x128xf32>
    %5 = vector.extract_strided_slice %1 {offsets = [0, 0], sizes = [15, 128], strides = [1, 1]} : vector<16x128xf32> to vector<15x128xf32>
    %6 = tpu.concatenate %4, %5 in 0 : vector<1x128xf32>, vector<15x128xf32> -> vector<16x128xf32>
    %cst_4 = arith.constant 0.0965323522 : f32
    %7 = vector.broadcast %cst_4 : f32 to vector<16x128xf32>
    %8 = arith.mulf %6, %7 : vector<16x128xf32>
    %9 = arith.addf %3, %8 : vector<16x128xf32>
    %10 = vector.extract_strided_slice %1 {offsets = [1, 0], sizes = [15, 128], strides = [1, 1]} : vector<16x128xf32> to vector<15x128xf32>
    %cst_5 = arith.constant 0.000000e+00 : f32
    %11 = vector.broadcast %cst_5 : f32 to vector<1x128xf32>
    %12 = tpu.concatenate %10, %11 in 0 : vector<15x128xf32>, vector<1x128xf32> -> vector<16x128xf32>
    %cst_6 = arith.constant 0.0965323522 : f32
    %13 = vector.broadcast %cst_6 : f32 to vector<16x128xf32>
    %14 = arith.mulf %12, %13 : vector<16x128xf32>
    %15 = arith.addf %9, %14 : vector<16x128xf32>
    %cst_7 = arith.constant 1.000000e+00 : f32
    %16 = vector.broadcast %cst_7 : f32 to vector<16x128xf32>
    %17 = arith.mulf %15, %16 : vector<16x128xf32>
    %18 = tpu.iota {dimensions = array<i32: 1>} : vector<16x128xi32>
    %c1_i32 = arith.constant 1 : i32
    %19 = tpu.dynamic_rotate %15 by %c1_i32 dim 1 : vector<16x128xf32>, i32 -> vector<16x128xf32>
    %c1_i32_8 = arith.constant 1 : i32
    %20 = vector.broadcast %c1_i32_8 : i32 to vector<16x128xi32>
    %21 = arith.cmpi sge, %18, %20 : vector<16x128xi32>
    %cst_9 = arith.constant 0.000000e+00 : f32
    %22 = vector.broadcast %cst_9 : f32 to vector<16x128xf32>
    %23 = arith.select %21, %19, %22 : vector<16x128xi1>, vector<16x128xf32>
    %cst_10 = arith.constant 0.606530666 : f32
    %24 = vector.broadcast %cst_10 : f32 to vector<16x128xf32>
    %25 = arith.mulf %23, %24 : vector<16x128xf32>
    %26 = arith.addf %17, %25 : vector<16x128xf32>
    %c127_i32 = arith.constant 127 : i32
    %27 = tpu.dynamic_rotate %15 by %c127_i32 dim 1 : vector<16x128xf32>, i32 -> vector<16x128xf32>
    %c127_i32_11 = arith.constant 127 : i32
    %28 = vector.broadcast %c127_i32_11 : i32 to vector<16x128xi32>
    %29 = arith.cmpi slt, %18, %28 : vector<16x128xi32>
    %cst_12 = arith.constant 0.000000e+00 : f32
    %30 = vector.broadcast %cst_12 : f32 to vector<16x128xf32>
    %31 = arith.select %29, %27, %30 : vector<16x128xi1>, vector<16x128xf32>
    %cst_13 = arith.constant 0.606530666 : f32
    %32 = vector.broadcast %cst_13 : f32 to vector<16x128xf32>
    %33 = arith.mulf %31, %32 : vector<16x128xf32>
    %34 = arith.addf %26, %33 : vector<16x128xf32>
    %cst_14 = arith.constant 4.000000e-01 : f32
    %35 = vector.broadcast %cst_14 : f32 to vector<16x128xf32>
    %36 = arith.cmpf ogt, %34, %35 : vector<16x128xf32>
    %37 = arith.extui %36 : vector<16x128xi1> to vector<16x128xi32>
    %38 = arith.sitofp %37 : vector<16x128xi32> to vector<16x128xf32>
    %39 = vector.shape_cast %38 : vector<16x128xf32> to vector<1x16x128xf32>
    %cst_15 = arith.constant dense<0.000000e+00> : vector<1xf32>
    %40 = vector.multi_reduction <add>, %39, %cst_15 [1, 2] : vector<1x16x128xf32> to vector<1xf32>
    %41 = vector.shape_cast %40 : vector<1xf32> to vector<1x1x1xf32>
    %42 = vector.extract %41[0, 0, 0] : f32 from vector<1x1x1xf32>
    %43 = vector.broadcast %42 : f32 to vector<1x8x128xf32>
    %c0_16 = arith.constant 0 : index
    %c0_17 = arith.constant 0 : index
    %c0_18 = arith.constant 0 : index
    %44 = vector.load %arg4[%c0_16, %c0_17, %c0_18] : memref<1x8x128xf32, #tpu.memory_space<vmem>>, vector<1x8x128xf32>
    tpu.vector_store %arg4[%c0_16, %c0_17, %c0_18], %43 {strides = array<i32>} : memref<1x8x128xf32, #tpu.memory_space<vmem>>, vector<1x8x128xf32>,
    %cst_19 = arith.constant 0.000000e+00 : f32
    %45 = vector.broadcast %cst_19 : f32 to vector<16x128xf32>
    %46 = arith.select %36, %34, %45 : vector<16x128xi1>, vector<16x128xf32>
    %47 = vector.shape_cast %46 : vector<16x128xf32> to vector<1x1x16x128xf32>
    %48 = vector.shape_cast %47 : vector<1x1x16x128xf32> to vector<1x1x16x128xf32>
    %49 = vector.broadcast %48 : vector<1x1x16x128xf32> to vector<2x1x16x128xf32>
    %c0_20 = arith.constant 0 : index
    %c0_21 = arith.constant 0 : index
    %c0_22 = arith.constant 0 : index
    %c0_23 = arith.constant 0 : index
    %50 = vector.load %arg2[%c0_20, %c0_21, %c0_22, %c0_23] : memref<2x1x16x128xf32, #tpu.memory_space<vmem>>, vector<2x1x16x128xf32>
    tpu.vector_store %arg2[%c0_20, %c0_21, %c0_22, %c0_23], %49 {strides = array<i32>} : memref<2x1x16x128xf32, #tpu.memory_space<vmem>>, vector<2x1x16x128xf32>,
    %51 = arith.extui %36 : vector<16x128xi1> to vector<16x128xi32>
    %52 = arith.sitofp %51 : vector<16x128xi32> to vector<16x128xf32>
    %53 = arith.truncf %52 : vector<16x128xf32> to vector<16x128xbf16>
    %54 = vector.shape_cast %53 : vector<16x128xbf16> to vector<1x1x16x128xbf16>
    %55 = vector.shape_cast %54 : vector<1x1x16x128xbf16> to vector<1x1x16x128xbf16>
    %56 = vector.broadcast %55 : vector<1x1x16x128xbf16> to vector<2x1x16x128xbf16>
    %c0_24 = arith.constant 0 : index
    %c0_25 = arith.constant 0 : index
    %c0_26 = arith.constant 0 : index
    %c0_27 = arith.constant 0 : index
    %57 = vector.load %arg3[%c0_24, %c0_25, %c0_26, %c0_27] : memref<2x1x16x128xbf16, #tpu.memory_space<vmem>>, vector<2x1x16x128xbf16>
    tpu.vector_store %arg3[%c0_24, %c0_25, %c0_26, %c0_27], %56 {strides = array<i32>} : memref<2x1x16x128xbf16, #tpu.memory_space<vmem>>, vector<2x1x16x128xbf16>,
    %58 = arith.index_cast %arg0 : i32 to index
    %c0_28 = arith.constant 0 : index
    %c0_29 = arith.constant 0 : index
    %c0_30 = arith.constant 0 : index
    %59 = vector.load %arg2[%58, %c0_28, %c0_29, %c0_30] : memref<2x1x16x128xf32, #tpu.memory_space<vmem>>, vector<1x1x16x128xf32>
    %60 = vector.shape_cast %59 : vector<1x1x16x128xf32> to vector<16x128xf32>
    %61 = vector.shape_cast %34 : vector<16x128xf32> to vector<1x1x16x128xf32>
    tpu.vector_store %arg2[%58, %c0_28, %c0_29, %c0_30], %61 {strides = array<i32>} : memref<2x1x16x128xf32, #tpu.memory_space<vmem>>, vector<1x1x16x128xf32>,
    %cst_31 = arith.constant 1.000000e+00 : bf16
    %62 = vector.broadcast %cst_31 : bf16 to vector<16x128xbf16>
    %63 = arith.index_cast %arg0 : i32 to index
    %c0_32 = arith.constant 0 : index
    %c0_33 = arith.constant 0 : index
    %c0_34 = arith.constant 0 : index
    %64 = vector.load %arg3[%63, %c0_32, %c0_33, %c0_34] : memref<2x1x16x128xbf16, #tpu.memory_space<vmem>>, vector<1x1x16x128xbf16>
    %65 = vector.shape_cast %64 : vector<1x1x16x128xbf16> to vector<16x128xbf16>
    %66 = vector.shape_cast %62 : vector<16x128xbf16> to vector<1x1x16x128xbf16>
    tpu.vector_store %arg3[%63, %c0_32, %c0_33, %c0_34], %66 {strides = array<i32>} : memref<2x1x16x128xbf16, #tpu.memory_space<vmem>>, vector<1x1x16x128xbf16>,
    return
  }
  func.func @transform_0(%arg0: i32) -> (i32, i32, i32, i32) {
    %c0_i32 = arith.constant 0 : i32
    %c0_i32_0 = arith.constant 0 : i32
    %c0_i32_1 = arith.constant 0 : i32
    %c0_i32_2 = arith.constant 0 : i32
    return %arg0, %c0_i32, %c0_i32_0, %c0_i32_1 : i32, i32, i32, i32
  }
  func.func @transform_1(%arg0: i32) -> (i32, i32, i32, i32) {
    %c0_i32 = arith.constant 0 : i32
    %c0_i32_0 = arith.constant 0 : i32
    %c0_i32_1 = arith.constant 0 : i32
    %c0_i32_2 = arith.constant 0 : i32
    return %c0_i32, %arg0, %c0_i32_0, %c0_i32_1 : i32, i32, i32, i32
  }
  func.func @transform_2(%arg0: i32) -> (i32, i32, i32, i32) {
    %c0_i32 = arith.constant 0 : i32
    %c0_i32_0 = arith.constant 0 : i32
    %c0_i32_1 = arith.constant 0 : i32
    %c0_i32_2 = arith.constant 0 : i32
    return %c0_i32, %arg0, %c0_i32_0, %c0_i32_1 : i32, i32, i32, i32
  }
  func.func @transform_3(%arg0: i32) -> (i32, i32, i32) {
    %c0_i32 = arith.constant 0 : i32
    %c0_i32_0 = arith.constant 0 : i32
    %c0_i32_1 = arith.constant 0 : i32
    return %arg0, %c0_i32, %c0_i32_0 : i32, i32, i32
  }
}

</mosaic_0001>

<bundles_post_ra>
// kernel: run.1
= control target key start
LH: loop header
LB: loop body
LE: loop exit
PB: predicated region body
PF: predicated region fallthrough
CT: control target
= control target key end

     0   :  { %9 = vsyncpa [#allocation3], 0  ;;  %s976_s0 = inlined_call_operand.hbm [shape: f32[2,1,16,128], index: 0, kind: input, shape index: {}]   ;;  %s977_s1 = inlined_call_operand.hbm [shape: f32[2,2,16,128], index: 1, kind: output, shape index: {0}]   ;;  %s978_s2 = inlined_call_operand.hbm [shape: bf16[2,2,16,128], index: 2, kind: output, shape index: {1}]   ;;  %s979_s3 = inlined_call_operand.vmem [shape: f32[2,8,128], index: 3, kind: output, shape index: {2}]  }
   0x1   :  { %11 = vsyncpa [#allocation3 + $0x1], 0 }
   0x2   :  { %12 = vsyncpa [#allocation4], 0 }
   0x3   :  { %14 = vsyncpa [#allocation4 + $0x1], 0 }
   0x4   :  { %15 = vsyncpa [#allocation7], 0 }
   0x5   :  { %17 = vsyncpa [#allocation7 + $0x1], 0  ;;  %s780_s12 = smov 0   ;;  %s782_s13 = smov 0  }
   0x6   :  { %s784_s14 = smov 0   ;;  %s786_s15 = smov 0  }
   0x7 LB: > { %s801_s16 = sadd.s32 4294967295, %s737_s15   ;;  %s541_s17 = sadd.s32 4294967294, %s737_s15   ;;  %s737_s15 = sphi %s786_s15, %s992_s15   ;;  %s733_s14 = sphi %s784_s14, %s991_s14   ;;  %s729_s13 = sphi %s782_s13, %s990_s13   ;;  %s725_s12 = sphi %s780_s12, %s989_s12  }
   0x8   : > { %s805_s18 = sadd.s32 1, %s737_s15   ;;  %s30_s19 = sadd.s32 1, %s733_s14 }
   0x9   : > { %s27_s20 = ssub.s32 %s737_s15, %s805_s18  ;;  %p37_p0 = scmp.ne.s32.totalorder %s733_s14, %s729_s13 }
   0xa   : > { %p28_p1 = scmp.eq.s32.totalorder %s27_s20, 0  ;;  %p38_p2 = scmp.eq.s32.totalorder %s737_s15, 0 }
   0xb   : > { %p43_p3 = scmp.ne.s32.totalorder %s729_s13, %s725_s12  ;;  %p44_p4 = scmp.eq.s32.totalorder %s801_s16, 0 }
   0xc   : > { %s817_s21 = scalar_select %p28_p1, %s733_s14, %s30_s19  }
   0xd   : > { %p819_p5 = por %p38_p2, %p37_p0  ;;  %p823_p6 = por %p44_p4, %p43_p3 }
   0xe   : > { %p67_p7 = scmp.eq.s32.totalorder %s801_s16, 1  ;;  %p73_p8 = scmp.eq.s32.totalorder %s541_s17, 1 }
   0xf   : > { %p611_p10 = scmp.lt.s32.totalorder %s737_s15, 2  ;;  %s145_s26 = sand.u32 1, %s733_s14  }
  0x10   : > { %p830_p11 = por %p67_p7, %p37_p0  ;;  %p834_p12 = por %p73_p8, %p43_p3 }
  0x11   : > { %s567_s27 = sshll.u32 %s737_s15, 8  ;;  %s544_s28 = sshll.u32 %s145_s26, 4 }
  0x12   : > { %s983_s24 = scalar_select %p830_p11, 1, 0 }
  0x13   : > { %s984_s25 = scalar_select %p834_p12, 1, 0 }
  0x14   : > { %s843_s4 = scalar_lea.hbm %s976_s0, %s567_s27  ;;  %s149_s5 = scalar_lea.vmem [#allocation2], %s544_s28 }
  0x15   : > { %s156_s6 = sshll.u32 %s149_s5, 4  ;;  %p847_p13 = pnand %p611_p10, %p819_p5  ;;  %s851_s6 = int_to_ptr.vmem [resolvable:$true] %s156_s6 }
  0x16   : > { %s853_s8 = scalar_lea.sflag [#allocation3], %s145_s26  ;;  %s665_s9 = scalar_lea.hbm %s843_s4, 256 }
  0x17   : > { %p666_p0 = scmp.ne.s32.totalorder %s843_s4, %s665_s9  ;;  %p667_p1 = pneg %p847_p13 }
  0x18   : > { %s670_s17 = scalar_lea.hbm %s976_s0, 512  ;;  %p671_p4 = scmp.lt.u32.totalorder %s843_s4, %s976_s0 }
  0x19   : > { %p668_p2 = pnand %p667_p1, %p666_p0  ;;  %p672_p5 = scmp.lt.u32.totalorder %s670_s17, %s665_s9 }
  0x1a   : > { %p674_p8 = scmp.lt.u32.totalorder %s665_s9, %s843_s4 }
  0x1b   : > { %p669_p3 = pneg %p668_p2  ;;  %p673_p7 = por %p672_p5, %p671_p4 }
  0x1d   : > { %p675_p10 = por %p674_p8, %p673_p7 }
  0x1f   : > { %p676_p9 = pnand %p675_p10, %p669_p3 }
  0x21   : > { %679 = shalt.err (!%p676_p9)
}
  0x22   : > { %s680_s22 = scalar_lea.vmem %s851_s6, 256  ;;  %s739_s26 = smov [#allocation2]  }
  0x23   : > { %p681_p0 = scmp.ne.s32.totalorder %s851_s6, %s680_s22  ;;  %s685_s27 = sshll.u32 %s739_s26, 4  ;;  %s686_s27 = int_to_ptr.vmem [resolvable:$false] %s685_s27 }
  0x24   : > { %s687_s28 = scalar_lea.vmem %s686_s27, 512  ;;  %p688_p11 = scmp.lt.s32.totalorder %s851_s6, %s686_s27 }
  0x25   : > { %p683_p2 = pnand %p681_p0, %p667_p1  ;;  %p689_p4 = scmp.lt.s32.totalorder %s687_s28, %s680_s22 }
  0x27   : > { %p684_p12 = pneg %p683_p2  ;;  %p690_p5 = por %p689_p4, %p688_p11 }
  0x29   : > { %p691_p7 = pnand %p690_p5, %p684_p12 }
  0x2b   : > { %694 = shalt.err (!%p691_p7)
}
  0x2c   : > { %s740_s29 = smov 128   ;;  %s741_s30 = smov 8  }
  0x2d   : > { %603 = dma.hbm_to_vmem [thread:$0]  (!%p847_p13), %s843_s4, 256, %s851_s6, %s853_s8, %s740_s29, %s740_s29, %s741_s30  }
  0x2e   : > { %p547_p9 = scmp.ge.s32.totalorder %s737_s15, 1  ;;  %p164_p1 = scmp.lt.s32.totalorder %s737_s15, 3 }
  0x30   : > { %p165_p3 = pnand %p547_p9, %p164_p1 }
  0x31   : > { %s884_s5 = sand.u32 (!%p165_p3), 1, %s729_s13  }
  0x32   : > { %168 = sbr.rel (%p165_p3) target bundleno = 424 (0x1a8), region = 24  ;;  %s548_s9 = sshll.u32 (!%p165_p3), %s884_s5, 4 }
  0x33   : > { %s171_s10 = scalar_lea.sflag (!%p165_p3), [#allocation3], %s884_s5  ;;  %s174_s11 = scalar_lea.vmem (!%p165_p3), [#allocation2], %s548_s9 }
  0x39   : > { %712 = dma.done.wait (%p823_p6), %s171_s10, 256  }
  0x3a   : > { %714 = vsyncadd (%p823_p6), %s171_s10, 4294967040  ;;  %v211_v0 = vld [vmem:[%s174_s11] sm:$0xff]  ;;  %v212_v1 = vld [vmem:[%s174_s11 + $0x8] sm:$0xff]  ;;  %vm217_vm0 = vcmask 1040384   ;;  %vm228_vm1 = vcmask 1046528   ;;  %s742_s23 = smov 1   ;;  %v239_v20 = vlaneseq }
  0x3b   : > { %v218_v2 = vrot.slane %v211_v0, 7  ;;  %v229_v3 = vrot.slane %v211_v0, 1  ;;  %v230_v4 = vrot.slane %v212_v1, 1  ;;  %v213_v5 = vmul.f32 0.15915494, %v211_v0  ;;  %s743_s4 = smov 127  }
  0x3c   : > { %v219_v6 = vrot.slane %v212_v1, 7  ;;  %v214_v9 = vmul.f32 0.15915494, %v212_v1  ;;  %v240_v21 = vand.u32 127, %v239_v20  ;;  %s549_s6 = sshll.u32 %s884_s5, 5  ;;  %s556_s7 = sshll.u32 %s801_s16, 4 }
  0x3d   : > { %v223_v7 = vsel %vm217_vm0, 0.0, %v218_v2  ;;  %v231_v8 = vsel %vm228_vm1, %v229_v3, %v230_v4  ;;  %v234_v10 = vsel %vm228_vm1, %v230_v4, 0.0  ;;  %s896_s8 = scalar_lea.vmem [#allocation5], %s549_s6  ;;  %s570_s17 = sshll.u32 %s801_s16, 3  ;;  %v744_v39 = vmov 0.0  }
  0x3e   : > { %v224_v11 = vmul.f32 0.09653235, %v223_v7  ;;  %v235_v12 = vmul.f32 0.09653235, %v231_v8  ;;  %v220_v13 = vsel %vm217_vm0, %v218_v2, %v219_v6  ;;  %v236_v16 = vmul.f32 0.09653235, %v234_v10  ;;  %s300_s19 = scalar_lea.vmem %s896_s8, %s556_s7 [#allocation5] }
  0x3f   : > { %v225_v14 = vmul.f32 0.09653235, %v220_v13  ;;  %vm245_vm2 = vcmp.ge.s32.totalorder %v240_v21, 1  ;;  %vm256_vm3 = vcmp.lt.s32.totalorder %v240_v21, 127  ;;  %s906_s20 = scalar_lea.vmem [#allocation6], %s548_s9  ;;  %p206_p6 = scmp.lt.s32.totalorder %s801_s16, 1 }
  0x40   : > { %v226_v15 = vadd.f32 %v224_v11, %v213_v5  ;;  %s305_s22 = scalar_lea.vmem %s906_s20, %s570_s17 [#allocation6]  ;;  %v745_v45 = vmov 1065369472   ;;  %s309_s10 = scalar_lea.sflag [#allocation4], %s884_s5 }
  0x41   : > { %v227_v17 = vadd.f32 %v225_v14, %v214_v9  ;;  %s207_s26 = scalar_select %p206_p6, %s801_s16, 1 }
  0x42   : > { %v237_v18 = vadd.f32 %v235_v12, %v226_v15  ;;  %s314_s11 = scalar_lea.sflag [#allocation7], %s884_s5 }
  0x43   : > { %v238_v19 = vadd.f32 %v236_v16, %v227_v17  ;;  %s551_s27 = sshll.u32 %s207_s26, 3 }
  0x44   : > { %241 = vrot.lane.b32.xlu0 %v237_v18, %s742_s23  ;;  %252 = vrot.lane.b32.xlu1 %v237_v18, %s743_s4  ;;  %s209_s30 = scalar_lea.vmem %s979_s3, %s551_s27 }
  0x48   : > { %243 = vrot.lane.b32.xlu0 %v238_v19, %s742_s23  ;;  %254 = vrot.lane.b32.xlu1 %v238_v19, %s743_s4 }
  0xb6   : > { %v242_v22 = vpop.permute.xlu0 %241  ;;  %v253_v23 = vpop.permute.xlu1 %252 }
  0xb7   : > { %v246_v24 = vsel %vm245_vm2, %v242_v22, 0.0  ;;  %v257_v25 = vsel %vm256_vm3, %v253_v23, 0.0 }
  0xb8   : > { %v248_v26 = vmul.f32 0.60653067, %v246_v24  ;;  %v259_v27 = vmul.f32 0.60653067, %v257_v25 }
  0xba   : > { %v250_v28 = vadd.f32 %v248_v26, %v237_v18  ;;  %v244_v29 = vpop.permute.xlu0 %243  ;;  %v255_v30 = vpop.permute.xlu1 %254 }
  0xbb   : > { %v247_v31 = vsel %vm245_vm2, %v244_v29, 0.0  ;;  %v258_v32 = vsel %vm256_vm3, %v255_v30, 0.0 }
  0xbc   : > { %v261_v33 = vadd.f32 %v259_v27, %v250_v28  ;;  %v249_v34 = vmul.f32 0.60653067, %v247_v31  ;;  %v260_v35 = vmul.f32 0.60653067, %v258_v32 }
  0xbe   : > { %v251_v36 = vadd.f32 %v249_v34, %v238_v19  ;;  %vm263_vm4 = vcmp.gt.f32.partialorder %v261_v33, 0.4 }
  0xbf   : > { %v281_v37 = vsel %vm263_vm4, %v261_v33, 0.0  ;;  %v552_v40 = vsel %vm263_vm4, 1.0, %v744_v39 }
  0xc0   : > { %v262_v38 = vadd.f32 %v260_v35, %v251_v36  ;;  %283 = vst [vmem:[%s896_s8] sm:$0xff] %v281_v37  ;;  %285 = vst [vmem:[%s896_s8 + $0x10] sm:$0xff] %v281_v37 }
  0xc2   : > { %vm264_vm5 = vcmp.gt.f32.partialorder %v262_v38, 0.4 }
  0xc3   : > { %v553_v41 = vsel %vm264_vm5, 1.0, %v744_v39  ;;  %v282_v42 = vsel %vm264_vm5, %v262_v38, 0.0 }
  0xc4   : > { %v269_v43 = vadd.f32 %v553_v41, %v552_v40  ;;  %284 = vst [vmem:[%s896_s8 + $0x8] sm:$0xff] %v282_v42  ;;  %286 = vst [vmem:[%s896_s8 + $0x18] sm:$0xff] %v282_v42  ;;  %v574_v44 = vpack.c.bf16 %v553_v41, %v552_v40 }
  0xc5   : > { %301 = vst [vmem:[%s300_s19] sm:$0xff] %v261_v33  ;;  %302 = vst [vmem:[%s300_s19 + $0x8] sm:$0xff] %v262_v38 }
  0xc6   : > { %575 = vst [vmem:[%s906_s20] sm:$0xff] %v574_v44   ;;  %579 = vst [vmem:[%s906_s20 + $0x8] sm:$0xff] %v574_v44   ;;  %270 = vadd.xlane.f32.xlu0 %v269_v43 }
  0xc7   : > { %306 = vst [vmem:[%s305_s22] sm:$0xf] %v745_v45  ;;  %307 = vst [vmem:[%s305_s22 + $0x4] sm:$0xf] %v745_v45 }
 0x153   : > { %v271_v46 = vpop.xlane.xlu0 %270 }
 0x154   : > { %v272_v47 = vrot.slane %v271_v46, 4 }
 0x156   : > { %v273_v48 = vadd.f32 %v272_v47, %v271_v46 }
 0x158   : > { %v274_v49 = vrot.slane %v273_v48, 2 }
 0x15a   : > { %v275_v50 = vadd.f32 %v274_v49, %v273_v48 }
 0x15c   : > { %v276_v51 = vrot.slane %v275_v50, 1 }
 0x15e   : > { %v277_v52 = vadd.f32 %v276_v51, %v275_v50 }
 0x160   : > { %580 = vpush %v277_v52 }
 0x191   : > { %s581_s9 = spop %580 }
 0x192   : > { %v279_v53 = vstv %s581_s9 }
 0x193   : > { %280 = vst [vmem:[%s209_s30] sm:$0xff] %v279_v53 }
 0x194   : > { %s571_s23 = sshll.u32 %s801_s16, 8  ;;  %s347_s4 = sshll.u32 %s896_s8, 4  ;;  %s348_s4 = int_to_ptr.vmem [resolvable:$true] %s347_s4 }
 0x195   : > { %s330_s17 = scalar_lea.hbm %s977_s1, %s571_s23  ;;  %s746_s19 = smov 256  }
 0x196   : > { %p986_p11 = scmp.ne.s32.totalorder %s983_s24, 0  ;;  %s747_s22 = smov 512  }
 0x197   : > { %s748_s26 = smov 2   ;;  %s749_s27 = smov 128  }
 0x198   : > { %584 = sst [smem:[#allocation9]] (%p986_p11), %s746_s19  ;;  %s750_s8 = smov 8  }
 0x199   : > { %585 = sst [smem:[#allocation9 + $0x1]] (%p986_p11), %s747_s22  ;;  %s751_s28 = smov [#allocation8]  }
 0x19a   : > { %586 = sst [smem:[#allocation9 + $0x2]] (%p986_p11), %s748_s26  ;;  %s752_s29 = smov 0  }
 0x19b   : > { %587 = sst [smem:[#allocation9 + $0x3]] (%p986_p11), %s749_s27 }
 0x19c   : > { %588 = sst [smem:[#allocation9 + $0x4]] (%p986_p11), %s749_s27 }
 0x19d   : > { %589 = sst [smem:[#allocation9 + $0x5]] (%p986_p11), %s750_s8 }
 0x19e   : > { %590 = dma.general (%p986_p11), %s348_s4, 512, %s330_s17, %s309_s10, %s751_s28, [#allocation9], %s752_s29, 0  }
 0x19f   : > { %s572_s30 = sshll.u32 %s801_s16, 7  ;;  %s392_s9 = sshll.u32 %s906_s20, 4  ;;  %s393_s9 = int_to_ptr.vmem [resolvable:$true] %s392_s9 }
 0x1a0   : > { %s375_s7 = scalar_lea.hbm %s978_s2, %s572_s30  ;;  %s753_s19 = smov 128  }
 0x1a1   : > { %591 = sst [smem:[#allocation11]] (%p986_p11), %s753_s19  ;;  %s754_s10 = smov 256  }
 0x1a2   : > { %592 = sst [smem:[#allocation11 + $0x1]] (%p986_p11), %s754_s10  ;;  %s755_s4 = smov 2  }
 0x1a3   : > { %593 = sst [smem:[#allocation11 + $0x2]] (%p986_p11), %s755_s4  ;;  %s756_s17 = smov 64  }
 0x1a4   : > { %594 = sst [smem:[#allocation11 + $0x3]] (%p986_p11), %s756_s17  ;;  %s757_s16 = smov 4  }
 0x1a5   : > { %595 = sst [smem:[#allocation11 + $0x4]] (%p986_p11), %s756_s17  ;;  %s758_s20 = smov [#allocation10]  }
 0x1a6   : > { %596 = sst [smem:[#allocation11 + $0x5]] (%p986_p11), %s757_s16  ;;  %s759_s22 = smov 0  }
 0x1a7   : > { %597 = dma.general (%p986_p11), %s393_s9, 256, %s375_s7, %s314_s11, %s758_s20, [#allocation11], %s759_s22, 0  }
 0x1a8 PF: > { %s423_s26 = sand.u32 1, %s725_s12   ;;  %p987_p12 = scmp.ne.s32.totalorder %s984_s25, 0 }
 0x1a9   : > { %p988_p13 = scmp.ge.s32.totalorder %s737_s15, 2  ;;  %s424_s27 = scalar_lea.sflag [#allocation4], %s423_s26 }
 0x1ab   : > { %p605_p8 = pnand %p988_p13, %p987_p12 }
 0x1ad   : > { %716 = dma.done.wait (!%p605_p8), %s424_s27, 512  }
 0x1ae   : > { %718 = vsyncadd (!%p605_p8), %s424_s27, 4294966784  ;;  %s433_s8 = scalar_lea.sflag [#allocation7], %s423_s26 }
 0x1af   : > { %720 = dma.done.wait (!%p605_p8), %s433_s8, 256  }
 0x1b0   : > { %722 = vsyncadd (!%p605_p8), %s433_s8, 4294967040  ;;  %p20_p10 = scmp.ge.s32.totalorder %s805_s18, 4   ;;  %s989_s12 = smov %s729_s13 }
 0x1b1   : > { %s990_s13 = smov %s733_s14  ;;  %s991_s14 = smov %s817_s21 }
 0x1b2   : > { %s992_s15 = smov %s805_s18  ;;  %22 = sbr.rel (!%p20_p10) target bundleno = 7 (0x7), region = 110 }
 0x1b9   :  { %445 = vsyncpa [#allocation3], 1 }
 0x1ba   :  { %447 = vsyncpa [#allocation3 + $0x1], 1 }
 0x1bb   :  { %448 = vsyncpa [#allocation4], 1 }
 0x1bc   :  { %450 = vsyncpa [#allocation4 + $0x1], 1 }
 0x1bd   :  { %451 = vsyncpa [#allocation7], 1 }
 0x1be   :  { %453 = vsyncpa [#allocation7 + $0x1], 1 }

</bundles_post_ra>
